<compile_context>
chip_gen: v7x
topology: tpu7x:2x2x1
jax: 0.10.0
libtpu: 0.0.40
codegen_flags: <defaults>
</compile_context>

<pallas_src>
import jax
import jax.numpy as jnp
from jax.experimental import pallas as pl
from jax.experimental.pallas import tpu as pltpu

_LANE = 128


def _double_kernel(x_ref, o_ref):
    # Load the tile once (one vld per vreg), double on the VPU, dense store.
    v = x_ref[...]
    o_ref[...] = v + v


def _pick_block_config():
    """Returns (target block bytes, scoped-VMEM limit bytes) per TPU generation."""
    try:
        kind = jax.devices()[0].device_kind.lower()
    except Exception:
        kind = ""
    if "v7" in kind:
        # v7x: highest HBM BW -> per-step overhead matters most; 8 MiB blocks.
        # Pipelined footprint = 4x block (double-buffered in + out) = 32 MiB,
        # so raise the scoped-VMEM limit above the 32 MiB default (64 MiB phys).
        return 8 * 1024 * 1024, 40 << 20
    if "v5 lite" in kind or "v5e" in kind or "v5lite" in kind:
        # v5e: 0.82 TB/s; a 2 MiB block already hides the ~0.35us/step overhead
        # and keeps the footprint well clear of the 16 MiB default scoped VMEM.
        return 2 * 1024 * 1024, 32 << 20
    # v6e (and default): 4 MiB block -> 16 MiB pipelined footprint (< 32 MiB).
    return 4 * 1024 * 1024, 32 << 20


def double(x: jax.Array, donate_input: bool = False) -> jax.Array:
    """Computes x + x with a Pallas TPU kernel (any shape/dtype).

    Set donate_input=True only when the caller can donate x (aliases the
    output onto the input HBM buffer; saves a full-size allocation).
    """
    orig_shape = x.shape
    n = x.size
    if n == 0:
        return x + x

    itemsize = jnp.dtype(x.dtype).itemsize
    # Minimum dense-tile sublane rows: 8 (32-bit), 16 (16-bit), 32 (8-bit).
    min_sublane = max(8, 32 // max(itemsize, 1))

    # Ragged (flat length not a multiple of 128) or sub-tile inputs: plain jnp.
    # Exactly one HBM read + one write of x (optimal); avoids the old
    # pad/concatenate + output-slice path (~2 extra full HBM passes) and the
    # fixed pallas_call launch cost on tiny tensors.
    if n % _LANE != 0 or n < min_sublane * _LANE:
        return x + x

    rows = n // _LANE
    x2d = jnp.reshape(x, (rows, _LANE))  # contiguous reshape: metadata only

    target_block_bytes, vmem_limit = _pick_block_config()
    tile_rows = max(min_sublane, target_block_bytes // (_LANE * itemsize))
    tile_rows -= tile_rows % min_sublane
    if rows <= tile_rows:
        # Small input: single block, rounded up to the minimum sublane multiple
        # (the partially out-of-bounds tail rows are read-padded/write-clipped).
        tile_rows = ((rows + min_sublane - 1) // min_sublane) * min_sublane
    grid = (pl.cdiv(rows, tile_rows),)  # ragged last row-block handled by Pallas

    out2d = pl.pallas_call(
        _double_kernel,
        out_shape=jax.ShapeDtypeStruct((rows, _LANE), x.dtype),
        grid_spec=pltpu.PrefetchScalarGridSpec(
            num_scalar_prefetch=0,
            grid=grid,
            in_specs=[pl.BlockSpec((tile_rows, _LANE), lambda i: (i, 0))],
            out_specs=pl.BlockSpec((tile_rows, _LANE), lambda i: (i, 0)),
        ),
        compiler_params=pltpu.CompilerParams(
            # Independent row-blocks: lets the grid shard across v7x's 2 TCs.
            dimension_semantics=("parallel",),
            vmem_limit_bytes=vmem_limit,
        ),
        cost_estimate=pl.CostEstimate(
            flops=n, transcendentals=0, bytes_accessed=2 * n * itemsize),
        input_output_aliases=({0: 0} if donate_input else {}),
    )(x2d)

    return jnp.reshape(out2d, orig_shape)


if __name__ == "__main__":
    key = jax.random.PRNGKey(0)

    # Main test: shape implied by the module spec (aligned kernel path).
    x = jax.random.normal(key, (2, 4, 16, 16), dtype=jnp.float32)
    out = double(x)
    jax.block_until_ready(out)
    expected = x + x
    assert out.shape == expected.shape and out.dtype == expected.dtype
    assert jnp.allclose(out, expected), "f32 mismatch vs reference"

    # bf16 coverage (16-sublane dense tiles, still the kernel path).
    xb = jax.random.normal(jax.random.PRNGKey(1), (4, 8, 64), dtype=jnp.bfloat16)
    outb = double(xb)
    jax.block_until_ready(outb)
    assert outb.dtype == xb.dtype and jnp.allclose(outb, xb + xb), "bf16 mismatch"

    # Ragged size exercises the optimal jnp fallback (no pad/concat passes).
    xr = jax.random.normal(jax.random.PRNGKey(2), (3, 5, 7), dtype=jnp.float32)
    outr = double(xr)
    jax.block_until_ready(outr)
    assert jnp.allclose(outr, xr + xr), "ragged mismatch"

    print("KERNEL_OK")
</pallas_src>

<mosaic_0001>
module attributes {stable_mosaic.version = 11 : i64} {
  func.func @_double_kernel(%arg0: i32, %arg1: memref<16x128xf32, #tpu.memory_space<vmem>>, %arg2: memref<16x128xf32, #tpu.memory_space<vmem>>) attributes {dimension_semantics = [#tpu.dimension_semantics<parallel>], iteration_bounds = array<i64: 1>, scalar_prefetch = 0 : i64, scratch_operands = 0 : i64, tpu.core_type = #tpu.core_type<tc>, window_params = [{transform_indices = @transform_0, window_bounds = array<i64: 16, 128>}, {transform_indices = @transform_1, window_bounds = array<i64: 16, 128>}]} {
    %c0 = arith.constant 0 : index
    %c0_0 = arith.constant 0 : index
    %0 = vector.load %arg1[%c0, %c0_0] : memref<16x128xf32, #tpu.memory_space<vmem>>, vector<16x128xf32>
    %1 = arith.addf %0, %0 : vector<16x128xf32>
    %c0_1 = arith.constant 0 : index
    %c0_2 = arith.constant 0 : index
    %2 = vector.load %arg2[%c0_1, %c0_2] : memref<16x128xf32, #tpu.memory_space<vmem>>, vector<16x128xf32>
    tpu.vector_store %arg2[%c0_1, %c0_2], %1 {strides = array<i32>} : memref<16x128xf32, #tpu.memory_space<vmem>>, vector<16x128xf32>,
    return
  }
  func.func @transform_0(%arg0: i32) -> (i32, i32) {
    %c0_i32 = arith.constant 0 : i32
    %c0_i32_0 = arith.constant 0 : i32
    return %arg0, %c0_i32 : i32, i32
  }
  func.func @transform_1(%arg0: i32) -> (i32, i32) {
    %c0_i32 = arith.constant 0 : i32
    %c0_i32_0 = arith.constant 0 : i32
    return %arg0, %c0_i32 : i32, i32
  }
}

</mosaic_0001>

<bundles_post_ra>
// kernel: tpu_custom_call.1
= control target key start
LH: loop header
LB: loop body
LE: loop exit
PB: predicated region body
PF: predicated region fallthrough
CT: control target
= control target key end

     0   :  { %6 = vsyncpa [#allocation3], 0  ;;  %s136_s0 = inlined_call_operand.hbm [shape: f32[16,128], index: 0, kind: input, shape index: {}]   ;;  %s137_s1 = inlined_call_operand.hbm [shape: f32[16,128], index: 1, kind: output, shape index: {}]  }
   0x1   :  { %7 = vsyncpa [#allocation4], 0  ;;  %s98_s6 = smov [#allocation2]   ;;  %s50_s10 = scalar_lea.hbm %s136_s0, 256 }
   0x2   :  { %s13_s7 = sshll.u32 %s98_s6, 4  ;;  %p51_p0 = scmp.ne.s32.totalorder %s136_s0, %s50_s10  ;;  %s14_s7 = int_to_ptr.vmem [resolvable:$true] %s13_s7 }
   0x3   :  { %p54_p1 = scmp.lt.u32.totalorder %s50_s10, %s136_s0 }
   0x5   :  { %p56_p2 = pnand %p54_p1, %p51_p0 }
   0x7   :  { %59 = shalt.err (!%p56_p2)
}
   0x8   :  { %s60_s15 = scalar_lea.vmem %s14_s7, 256  ;;  %p65_p4 = scmp.lt.s32.totalorder %s14_s7, %s14_s7 }
   0x9   :  { %p61_p3 = scmp.ne.s32.totalorder %s14_s7, %s60_s15  ;;  %p66_p5 = scmp.lt.s32.totalorder %s60_s15, %s60_s15 }
   0xb   :  { %p67_p6 = por %p66_p5, %p65_p4 }
   0xd   :  { %p68_p7 = pnand %p67_p6, %p61_p3 }
   0xf   :  { %71 = shalt.err (!%p68_p7)
}
  0x10   :  { %s99_s16 = smov 128   ;;  %s100_s17 = smov 8  }
  0x11   :  { %19 = dma.hbm_to_vmem [thread:$0]  %s136_s0, 256, %s14_s7, [#allocation3], %s99_s16, %s99_s16, %s100_s17  }
  0x12   :  { %94 = dma.done.wait [#allocation3], 256  }
  0x13   :  { %95 = vsyncadd [#allocation3], 4294967040  ;;  %s101_s20 = smov [#allocation5]   ;;  %v23_v0 = vld [vmem:[#allocation2] sm:$0xff]  ;;  %v24_v1 = vld [vmem:[#allocation2 + $0x8] sm:$0xff] }
  0x14   :  { %s34_s21 = sshll.u32 %s101_s20, 4  ;;  %v25_v2 = vadd.f32 %v23_v0, %v23_v0  ;;  %v26_v3 = vadd.f32 %v24_v1, %v24_v1  ;;  %s35_s21 = int_to_ptr.vmem [resolvable:$true] %s34_s21 }
  0x15   :  { %s72_s22 = scalar_lea.vmem %s35_s21, 256  ;;  %p77_p9 = scmp.lt.s32.totalorder %s35_s21, %s35_s21 }
  0x16   :  { %27 = vst [vmem:[#allocation5] sm:$0xff] %v25_v2  ;;  %28 = vst [vmem:[#allocation5 + $0x8] sm:$0xff] %v26_v3  ;;  %p73_p8 = scmp.ne.s32.totalorder %s35_s21, %s72_s22  ;;  %p78_p10 = scmp.lt.s32.totalorder %s72_s22, %s72_s22 }
  0x18   :  { %p79_p11 = por %p78_p10, %p77_p9 }
  0x1a   :  { %p80_p12 = pnand %p79_p11, %p73_p8 }
  0x1c   :  { %83 = shalt.err (!%p80_p12)
}
  0x1d   :  { %s84_s24 = scalar_lea.hbm %s137_s1, 256 }
  0x1e   :  { %p85_p13 = scmp.ne.s32.totalorder %s137_s1, %s84_s24  ;;  %p88_p0 = scmp.lt.u32.totalorder %s84_s24, %s137_s1 }
  0x20   :  { %p90_p1 = pnand %p88_p0, %p85_p13 }
  0x22   :  { %93 = shalt.err (!%p90_p1)
}
  0x23   :  { %40 = dma.vmem_to_hbm [thread:$0]  %s35_s21, 256, %s137_s1, [#allocation4], %s99_s16, %s99_s16, %s100_s17  }
  0x24   :  { %96 = dma.done.wait [#allocation4], 256  }
  0x25   :  { %97 = vsyncadd [#allocation4], 4294967040 }
  0x26   :  { %44 = vsyncpa [#allocation3], 1 }
  0x27   :  { %45 = vsyncpa [#allocation4], 1 }

</bundles_post_ra>
